<compile_context>
chip_gen: v7x
topology: tpu7x:2x2x1
jax: 0.10.0
libtpu: 0.0.40
codegen_flags: <defaults>
</compile_context>

<pallas_src>
import functools
import math

import jax
import jax.numpy as jnp
from jax import lax
from jax.experimental import pallas as pl
from jax.experimental.pallas import tpu as pltpu

LANES = 128
SUBLANES = 8
SUB_ROWS = 512  # strip-mine granularity inside a block (256 KiB f32 per operand)


def _num_tensorcores():
    """Best-effort TensorCore-per-chip count (megacore split). Defaults to 1."""
    try:
        kind = jax.devices()[0].device_kind.lower()
    except Exception:  # pragma: no cover - defensive
        return 1
    if "lite" in kind or "v5e" in kind or "v6e" in kind or "v2" in kind or "v3" in kind:
        return 1
    for tag in ("v7", "v5p", "v4"):
        if tag in kind:
            return 2
    return 1


def _mse_kernel(t_ref, x_ref, o_ref, acc_ref, *, block_rows, sub_rows,
                blocks_per_core, total_blocks, total_rows,
                ragged_last, has_oob_blocks):
    c = pl.program_id(0)   # core / parallel axis
    i = pl.program_id(1)   # sequential reduction axis
    blk = c * blocks_per_core + i

    @pl.when(i == 0)
    def _():
        acc_ref[...] = jnp.zeros_like(acc_ref)

    num_sub = block_rows // sub_rows

    def accumulate(masked):
        def fold(row_start):
            d = (t_ref[pl.ds(row_start, sub_rows), :].astype(jnp.float32)
                 - x_ref[pl.ds(row_start, sub_rows), :].astype(jnp.float32))
            sq = d * d
            if masked:
                row_ids = (blk * block_rows + row_start
                           + lax.broadcasted_iota(jnp.int32, (sub_rows, LANES), 0))
                # Keep the select form: OOB rows of a ragged last block may
                # contain NaN/Inf garbage and NaN * 0 = NaN.
                sq = jnp.where(row_ids < total_rows, sq, 0.0)
            # Pure vreg-wise adds into the (8,128) accumulator (VPU only).
            acc_ref[...] += jnp.sum(
                sq.reshape(sub_rows // SUBLANES, SUBLANES, LANES), axis=0)

        if num_sub == 1:
            fold(0)
        else:
            def body(j, carry):
                fold(pl.multiple_of(j * sub_rows, sub_rows))
                return carry
            lax.fori_loop(0, num_sub, body, 0)

    if ragged_last:
        # Only the single last valid block pays for the iota/compare/select.
        @pl.when(blk < total_blocks - 1)
        def _():
            accumulate(False)

        @pl.when(blk == total_blocks - 1)
        def _():
            accumulate(True)
    elif has_oob_blocks:
        # Skip clamped duplicate blocks outright; no per-element mask needed.
        @pl.when(blk < total_blocks)
        def _():
            accumulate(False)
    else:
        accumulate(False)

    @pl.when(i == pl.num_programs(1) - 1)
    def _():
        # Final cross-lane/sublane reduce in-kernel (XLU); broadcast the
        # per-core scalar into this core's output tile.
        total = jnp.sum(acc_ref[...])
        o_ref[...] = jnp.full(o_ref.shape, total, dtype=jnp.float32)


def rfdatat_loss(target, logits, *, block_rows=8192):
    """MSE(target.detach(), logits) as a Pallas TPU kernel. Returns a scalar f32."""
    assert target.shape == logits.shape, "target/logits shape mismatch"
    n_elems = math.prod(target.shape)
    if n_elems == 0:
        # torch.mean over an empty tensor is NaN.
        return jnp.float32(jnp.nan)

    t_flat = target.reshape(-1)
    x_flat = logits.reshape(-1)

    # Lane-align only when strictly needed (pad < 128 elements with zeros on
    # BOTH operands -> contributes 0).  The common n_elems % 128 == 0 case has
    # no wrapper-side copy; row raggedness vs. the block is masked in-kernel.
    rem = n_elems % LANES
    if rem:
        pad = LANES - rem
        t_flat = jnp.pad(t_flat, (0, pad))
        x_flat = jnp.pad(x_flat, (0, pad))
    rows = t_flat.shape[0] // LANES

    t2 = t_flat.reshape(rows, LANES)
    x2 = x_flat.reshape(rows, LANES)

    # Block sizing: multiple of SUB_ROWS when there is enough work (so the
    # strip-mine divides evenly), otherwise a single small multiple-of-8 block.
    block_rows = min(int(block_rows), rows)
    if block_rows >= SUB_ROWS:
        block_rows = (block_rows // SUB_ROWS) * SUB_ROWS
        sub_rows = SUB_ROWS
    else:
        block_rows = max(SUBLANES, (block_rows // SUBLANES) * SUBLANES)
        sub_rows = block_rows

    total_blocks = int(pl.cdiv(rows, block_rows))
    num_cores = min(_num_tensorcores(), total_blocks)
    blocks_per_core = int(pl.cdiv(total_blocks, num_cores))
    grid = (num_cores, blocks_per_core)

    ragged_last = (rows % block_rows) != 0
    has_oob_blocks = (num_cores * blocks_per_core) != total_blocks

    def in_map(c, i):
        # Clamp fully out-of-range block indices to the last valid block; the
        # pl.when gate in the kernel skips their contribution.
        return (jnp.minimum(c * blocks_per_core + i, total_blocks - 1), 0)

    kernel = functools.partial(
        _mse_kernel,
        block_rows=block_rows,
        sub_rows=sub_rows,
        blocks_per_core=blocks_per_core,
        total_blocks=total_blocks,
        total_rows=rows,
        ragged_last=ragged_last,
        has_oob_blocks=has_oob_blocks,
    )

    # 2 inputs x 2 pipeline buffers; cap well under v7x's 64 MiB physical VMEM.
    tile_bytes = block_rows * LANES * 4
    vmem_limit = int(min(48 * 1024 * 1024,
                         max(32 * 1024 * 1024, 4 * tile_bytes + (8 << 20))))

    partials = pl.pallas_call(
        kernel,
        out_shape=jax.ShapeDtypeStruct((num_cores, SUBLANES, LANES), jnp.float32),
        grid_spec=pltpu.PrefetchScalarGridSpec(
            num_scalar_prefetch=0,
            grid=grid,
            in_specs=[
                pl.BlockSpec((block_rows, LANES), in_map),
                pl.BlockSpec((block_rows, LANES), in_map),
            ],
            out_specs=pl.BlockSpec((1, SUBLANES, LANES), lambda c, i: (c, 0, 0)),
            scratch_shapes=[pltpu.VMEM((SUBLANES, LANES), jnp.float32)],
        ),
        compiler_params=pltpu.CompilerParams(
            dimension_semantics=("parallel", "arbitrary"),
            vmem_limit_bytes=vmem_limit,
        ),
    )(t2, x2)

    # Tiny final combine: one scalar per core + 1/N scale.
    return jnp.sum(partials[:, 0, 0]) * jnp.float32(1.0 / n_elems)


if __name__ == "__main__":
    key = jax.random.PRNGKey(0)
    k1, k2, k3, k4, k5, k6 = jax.random.split(key, 6)

    # Small NCHW-like inputs consistent with the module's forward signature.
    target = jax.random.normal(k1, (2, 4, 16, 16), dtype=jnp.float32)
    logits = jax.random.normal(k2, (2, 4, 16, 16), dtype=jnp.float32)

    loss = rfdatat_loss(target, logits)
    jax.block_until_ready(loss)
    ref = jnp.mean((target - logits) ** 2)
    assert jnp.allclose(loss, ref, rtol=1e-5, atol=1e-6), (loss, ref)

    # Lane-unaligned tail path (element count not a multiple of 128).
    t_odd = jax.random.normal(k3, (3, 5, 7, 11), dtype=jnp.float32)
    x_odd = jax.random.normal(k4, (3, 5, 7, 11), dtype=jnp.float32)
    loss_odd = rfdatat_loss(t_odd, x_odd)
    jax.block_until_ready(loss_odd)
    ref_odd = jnp.mean((t_odd - x_odd) ** 2)
    assert jnp.allclose(loss_odd, ref_odd, rtol=1e-5, atol=1e-6), (loss_odd, ref_odd)

    # Multi-block + ragged-last-block + strip-mined fori_loop path.
    t_big = jax.random.normal(k5, (2, 8, 96, 96), dtype=jnp.float32)
    x_big = jax.random.normal(k6, (2, 8, 96, 96), dtype=jnp.float32)
    loss_big = rfdatat_loss(t_big, x_big, block_rows=1024)
    jax.block_until_ready(loss_big)
    ref_big = jnp.mean((t_big - x_big) ** 2)
    assert jnp.allclose(loss_big, ref_big, rtol=1e-5, atol=1e-6), (loss_big, ref_big)

    print("KERNEL_OK")
</pallas_src>

<mosaic_0001>
module attributes {stable_mosaic.version = 11 : i64} {
  func.func @_mse_kernel(%arg0: i32, %arg1: i32, %arg2: memref<16x128xf32, #tpu.memory_space<vmem>>, %arg3: memref<16x128xf32, #tpu.memory_space<vmem>>, %arg4: memref<1x8x128xf32, #tpu.memory_space<vmem>>, %arg5: memref<8x128xf32, #tpu.memory_space<vmem>>) attributes {dimension_semantics = [#tpu.dimension_semantics<parallel>, #tpu.dimension_semantics<arbitrary>], iteration_bounds = array<i64: 1, 1>, scalar_prefetch = 0 : i64, scratch_operands = 1 : i64, tpu.core_type = #tpu.core_type<tc>, window_params = [{transform_indices = @transform_0, window_bounds = array<i64: 16, 128>}, {transform_indices = @transform_1, window_bounds = array<i64: 16, 128>}, {transform_indices = @transform_2, window_bounds = array<i64: 1, 8, 128>}]} {
    %c0_i32 = arith.constant 0 : i32
    %0 = arith.cmpi eq, %arg1, %c0_i32 : i32
    %1 = arith.extui %0 : i1 to i32
    %c0_i32_0 = arith.constant 0 : i32
    %2 = arith.cmpi ne, %1, %c0_i32_0 : i32
    scf.if %2 {
      %cst_10 = arith.constant 0.000000e+00 : f32
      %15 = vector.broadcast %cst_10 : f32 to vector<8x128xf32>
      %c0_11 = arith.constant 0 : index
      %c0_12 = arith.constant 0 : index
      %16 = vector.load %arg5[%c0_11, %c0_12] : memref<8x128xf32, #tpu.memory_space<vmem>>, vector<8x128xf32>
      tpu.vector_store %arg5[%c0_11, %c0_12], %15 {strides = array<i32>} : memref<8x128xf32, #tpu.memory_space<vmem>>, vector<8x128xf32>,
    } else {
    }
    %c0 = arith.constant 0 : index
    %c0_1 = arith.constant 0 : index
    %3 = vector.load %arg2[%c0, %c0_1] : memref<16x128xf32, #tpu.memory_space<vmem>>, vector<16x128xf32>
    %c0_2 = arith.constant 0 : index
    %c0_3 = arith.constant 0 : index
    %4 = vector.load %arg3[%c0_2, %c0_3] : memref<16x128xf32, #tpu.memory_space<vmem>>, vector<16x128xf32>
    %5 = arith.subf %3, %4 : vector<16x128xf32>
    %6 = arith.mulf %5, %5 : vector<16x128xf32>
    %c0_4 = arith.constant 0 : index
    %c0_5 = arith.constant 0 : index
    %7 = vector.load %arg5[%c0_4, %c0_5] : memref<8x128xf32, #tpu.memory_space<vmem>>, vector<8x128xf32>
    %8 = vector.shape_cast %6 : vector<16x128xf32> to vector<2x8x128xf32>
    %cst = arith.constant dense<0.000000e+00> : vector<8x128xf32>
    %9 = vector.multi_reduction <add>, %8, %cst [0] : vector<2x8x128xf32> to vector<8x128xf32>
    %10 = arith.addf %7, %9 : vector<8x128xf32>
    %c0_6 = arith.constant 0 : index
    %c0_7 = arith.constant 0 : index
    %11 = vector.load %arg5[%c0_6, %c0_7] : memref<8x128xf32, #tpu.memory_space<vmem>>, vector<8x128xf32>
    tpu.vector_store %arg5[%c0_6, %c0_7], %10 {strides = array<i32>} : memref<8x128xf32, #tpu.memory_space<vmem>>, vector<8x128xf32>,
    %c0_i32_8 = arith.constant 0 : i32
    %12 = arith.cmpi eq, %arg1, %c0_i32_8 : i32
    %13 = arith.extui %12 : i1 to i32
    %c0_i32_9 = arith.constant 0 : i32
    %14 = arith.cmpi ne, %13, %c0_i32_9 : i32
    scf.if %14 {
      %c0_10 = arith.constant 0 : index
      %c0_11 = arith.constant 0 : index
      %15 = vector.load %arg5[%c0_10, %c0_11] : memref<8x128xf32, #tpu.memory_space<vmem>>, vector<8x128xf32>
      %16 = vector.shape_cast %15 : vector<8x128xf32> to vector<1x8x128xf32>
      %cst_12 = arith.constant dense<0.000000e+00> : vector<1xf32>
      %17 = vector.multi_reduction <add>, %16, %cst_12 [1, 2] : vector<1x8x128xf32> to vector<1xf32>
      %18 = vector.shape_cast %17 : vector<1xf32> to vector<1x1x1xf32>
      %19 = vector.extract %18[0, 0, 0] : f32 from vector<1x1x1xf32>
      %20 = vector.broadcast %19 : f32 to vector<1x8x128xf32>
      %c0_13 = arith.constant 0 : index
      %c0_14 = arith.constant 0 : index
      %c0_15 = arith.constant 0 : index
      %21 = vector.load %arg4[%c0_13, %c0_14, %c0_15] : memref<1x8x128xf32, #tpu.memory_space<vmem>>, vector<1x8x128xf32>
      tpu.vector_store %arg4[%c0_13, %c0_14, %c0_15], %20 {strides = array<i32>} : memref<1x8x128xf32, #tpu.memory_space<vmem>>, vector<1x8x128xf32>,
    } else {
    }
    return
  }
  func.func @transform_0(%arg0: i32, %arg1: i32) -> (i32, i32) {
    %c1_i32 = arith.constant 1 : i32
    %0 = arith.muli %arg0, %c1_i32 : i32
    %1 = arith.addi %0, %arg1 : i32
    %c0_i32 = arith.constant 0 : i32
    %2 = arith.minsi %1, %c0_i32 : i32
    %c0_i32_0 = arith.constant 0 : i32
    %c0_i32_1 = arith.constant 0 : i32
    return %2, %c0_i32_0 : i32, i32
  }
  func.func @transform_1(%arg0: i32, %arg1: i32) -> (i32, i32) {
    %c1_i32 = arith.constant 1 : i32
    %0 = arith.muli %arg0, %c1_i32 : i32
    %1 = arith.addi %0, %arg1 : i32
    %c0_i32 = arith.constant 0 : i32
    %2 = arith.minsi %1, %c0_i32 : i32
    %c0_i32_0 = arith.constant 0 : i32
    %c0_i32_1 = arith.constant 0 : i32
    return %2, %c0_i32_0 : i32, i32
  }
  func.func @transform_2(%arg0: i32, %arg1: i32) -> (i32, i32, i32) {
    %c0_i32 = arith.constant 0 : i32
    %c0_i32_0 = arith.constant 0 : i32
    %c0_i32_1 = arith.constant 0 : i32
    return %arg0, %c0_i32, %c0_i32_0 : i32, i32, i32
  }
}

</mosaic_0001>

<bundles_post_ra>
// kernel: tpu_custom_call.1
= control target key start
LH: loop header
LB: loop body
LE: loop exit
PB: predicated region body
PF: predicated region fallthrough
CT: control target
= control target key end

     0   :  { %7 = vsyncpa [#allocation4], 0  ;;  %s247_s0 = inlined_call_operand.hbm [shape: f32[16,128], index: 0, kind: input, shape index: {}]   ;;  %s248_s1 = inlined_call_operand.hbm [shape: f32[16,128], index: 1, kind: input, shape index: {}]   ;;  %s249_s2 = inlined_call_operand.hbm [shape: f32[1,8,128], index: 2, kind: output, shape index: {}]  }
   0x1   :  { %8 = vsyncpa [#allocation7], 0 }
   0x2   :  { %9 = vsyncpa [#allocation5], 0  ;;  %s191_s9 = smov [#allocation3]   ;;  %s119_s13 = scalar_lea.hbm %s247_s0, 256 }
   0x3   :  { %s21_s10 = sshll.u32 %s191_s9, 4  ;;  %p120_p0 = scmp.ne.s32.totalorder %s247_s0, %s119_s13  ;;  %s22_s10 = int_to_ptr.vmem [resolvable:$true] %s21_s10 }
   0x4   :  { %p123_p1 = scmp.lt.u32.totalorder %s119_s13, %s247_s0 }
   0x6   :  { %p125_p2 = pnand %p123_p1, %p120_p0 }
   0x8   :  { %128 = shalt.err (!%p125_p2)
}
   0x9   :  { %s129_s18 = scalar_lea.vmem %s22_s10, 256  ;;  %p134_p4 = scmp.lt.s32.totalorder %s22_s10, %s22_s10 }
   0xa   :  { %p130_p3 = scmp.ne.s32.totalorder %s22_s10, %s129_s18  ;;  %p135_p5 = scmp.lt.s32.totalorder %s129_s18, %s129_s18 }
   0xc   :  { %p136_p6 = por %p135_p5, %p134_p4 }
   0xe   :  { %p137_p7 = pnand %p136_p6, %p130_p3 }
  0x10   :  { %140 = shalt.err (!%p137_p7)
}
  0x11   :  { %s192_s19 = smov 128   ;;  %s193_s20 = smov 8  }
  0x12   :  { %27 = dma.hbm_to_vmem [thread:$0]  %s247_s0, 256, %s22_s10, [#allocation4], %s192_s19, %s192_s19, %s193_s20  }
  0x13   :  { %s194_s23 = smov [#allocation6]   ;;  %s141_s27 = scalar_lea.hbm %s248_s1, 256 }
  0x14   :  { %s39_s24 = sshll.u32 %s194_s23, 4  ;;  %p142_p8 = scmp.ne.s32.totalorder %s248_s1, %s141_s27  ;;  %s40_s24 = int_to_ptr.vmem [resolvable:$true] %s39_s24 }
  0x15   :  { %p145_p9 = scmp.lt.u32.totalorder %s141_s27, %s248_s1 }
  0x17   :  { %p147_p10 = pnand %p145_p9, %p142_p8 }
  0x19   :  { %150 = shalt.err (!%p147_p10)
}
  0x1a   :  { %s151_s4 = scalar_lea.vmem %s40_s24, 256  ;;  %p156_p12 = scmp.lt.s32.totalorder %s40_s24, %s40_s24 }
  0x1b   :  { %p152_p11 = scmp.ne.s32.totalorder %s40_s24, %s151_s4  ;;  %p157_p13 = scmp.lt.s32.totalorder %s151_s4, %s151_s4 }
  0x1d   :  { %p158_p0 = por %p157_p13, %p156_p12 }
  0x1f   :  { %p159_p1 = pnand %p158_p0, %p152_p11 }
  0x21   :  { %162 = shalt.err (!%p159_p1)
}
  0x22   :  { %45 = dma.hbm_to_vmem [thread:$0]  %s248_s1, 256, %s40_s24, [#allocation7], %s192_s19, %s192_s19, %s193_s20  }
  0x23   :  { %185 = dma.done.wait [#allocation4], 256  }
  0x24   :  { %186 = vsyncadd [#allocation4], 4294967040 }
  0x25   :  { %187 = dma.done.wait [#allocation7], 256  }
  0x26   :  { %188 = vsyncadd [#allocation7], 4294967040  ;;  %v65_v0 = vld [vmem:[#allocation3] sm:$0xff]  ;;  %v66_v1 = vld [vmem:[#allocation3 + $0x8] sm:$0xff]  ;;  %s195_s1 = smov [#allocation8]  }
  0x27   :  { %v67_v2 = vld [vmem:[#allocation6] sm:$0xff]  ;;  %v68_v3 = vld [vmem:[#allocation6 + $0x8] sm:$0xff]  ;;  %s98_s6 = sshll.u32 %s195_s1, 4  ;;  %s99_s6 = int_to_ptr.vmem [resolvable:$true] %s98_s6 }
  0x28   :  { %v69_v4 = vsub.f32 %v65_v0, %v67_v2  ;;  %v70_v5 = vsub.f32 %v66_v1, %v68_v3  ;;  %s163_s8 = scalar_lea.vmem %s99_s6, 128  ;;  %p168_p3 = scmp.lt.s32.totalorder %s99_s6, %s99_s6 }
  0x29   :  { %p164_p2 = scmp.ne.s32.totalorder %s99_s6, %s163_s8  ;;  %p169_p4 = scmp.lt.s32.totalorder %s163_s8, %s163_s8 }
  0x2a   :  { %v71_v6 = vmul.f32 %v69_v4, %v69_v4  ;;  %v72_v7 = vmul.f32 %v70_v5, %v70_v5 }
  0x2b   :  { %p170_p5 = por %p169_p4, %p168_p3 }
  0x2c   :  { %v74_v8 = vadd.f32 %v72_v7, %v71_v6 }
  0x2d   :  { %p171_p6 = pnand %p170_p5, %p164_p2 }
  0x2e   :  { %81 = vadd.xlane.f32.xlu0 %v74_v8 }
  0xbb   :  { %v82_v9 = vpop.xlane.xlu0 %81 }
  0xbc   :  { %v83_v10 = vrot.slane %v82_v9, 4 }
  0xbe   :  { %v84_v11 = vadd.f32 %v83_v10, %v82_v9 }
  0xc0   :  { %v85_v12 = vrot.slane %v84_v11, 2 }
  0xc2   :  { %v86_v13 = vadd.f32 %v85_v12, %v84_v11 }
  0xc4   :  { %v87_v14 = vrot.slane %v86_v13, 1 }
  0xc6   :  { %v88_v15 = vadd.f32 %v87_v14, %v86_v13 }
  0xc8   :  { %112 = vpush %v88_v15 }
  0xf9   :  { %s113_s7 = spop %112 }
  0xfa   :  { %v90_v16 = vstv %s113_s7 }
  0xfb   :  { %91 = vst [vmem:[#allocation8] sm:$0xff] %v90_v16 }
  0xfc   :  { %174 = shalt.err (!%p171_p6)
}
  0xfd   :  { %s175_s11 = scalar_lea.hbm %s249_s2, 128 }
  0xfe   :  { %p176_p7 = scmp.ne.s32.totalorder %s249_s2, %s175_s11  ;;  %p179_p8 = scmp.lt.u32.totalorder %s175_s11, %s249_s2 }
 0x100   :  { %p181_p9 = pnand %p179_p8, %p176_p7 }
 0x102   :  { %184 = shalt.err (!%p181_p9)
}
 0x103   :  { %101 = dma.vmem_to_hbm [thread:$0]  %s99_s6, 128, %s249_s2, [#allocation5]  }
 0x104   :  { %189 = dma.done.wait [#allocation5], 128  }
 0x105   :  { %190 = vsyncadd [#allocation5], 4294967168 }
 0x106   :  { %105 = vsyncpa [#allocation4], 1 }
 0x107   :  { %106 = vsyncpa [#allocation7], 1 }
 0x108   :  { %107 = vsyncpa [#allocation5], 1 }

</bundles_post_ra>
